<compile_context>
chip_gen: v7x
topology: tpu7x:2x2x1
jax: 0.10.0
libtpu: 0.0.40
codegen_flags: <defaults>
</compile_context>

<pallas_src>
import jax
import jax.numpy as jnp
from jax.experimental import pallas as pl
from jax.experimental.pallas import tpu as pltpu


# --------------------------- fused whole-network kernel -----------------------
def make_net_kernel(n_conv, n_masked, n_fc, out_size):
    """Kernel closure: one grid point == one graph, everything VMEM-resident."""

    def kernel(g_ref, x_ref, m_ref, cw_ref, fw_ref, fb_ref, o_ref):
        g = g_ref[0]                        # (N, N)    adjacency of this graph
        h = x_ref[0]                        # (N, Fpad) node features (zero-padded lanes)
        m = m_ref[0]                        # (N, 1)    node validity mask
        n = g.shape[0]

        # eps = 0 GIN aggregation matrix (A + I); fold the row mask into it once.
        eye = (jax.lax.broadcasted_iota(jnp.int32, (n, n), 0) ==
               jax.lax.broadcasted_iota(jnp.int32, (n, n), 1)).astype(g.dtype)
        g_i = g + eye                       # unmasked aggregation (conv_after1)
        g_m = g_i * m                       # masked aggregation (bias=False, relu(0)=0)

        # GIN layers: h' = relu(((A+I) h) W); mask already folded into aggregation.
        for li in range(n_conv):
            a = g_m if li < n_masked else g_i
            agg = jnp.dot(a, h, preferred_element_type=jnp.float32)
            h = jnp.maximum(
                jnp.dot(agg, cw_ref[li], preferred_element_type=jnp.float32), 0.0)

        # hpool_arch is None -> identity.  Global mean pool over nodes -> (1, Fpad).
        z = jnp.mean(h, axis=0, keepdims=True)

        # FC head: relu on all but the last (output) layer.
        for fi in range(n_fc):
            z = jnp.dot(z, fw_ref[fi], preferred_element_type=jnp.float32) + fb_ref[fi]
            if fi < n_fc - 1:
                z = jnp.maximum(z, 0.0)

        o_ref[0] = z[:, :out_size].astype(o_ref.dtype)

    return kernel


def net_forward(params, x, G, mask):
    B, N, in_size = x.shape

    conv_ws = list(params["conv1"]) + list(params["conv2"]) + list(params["conv3"])
    n_conv = len(conv_ws)
    n_masked = len(params["conv1"]) + len(params["conv2"])

    fcs = [(params["fc1_w"], params["fc1_b"]),
           (params["fc2_w"], params["fc2_b"]),
           (params["out_w"], params["out_b"])]
    n_fc = len(fcs)
    out_size = params["out_w"].shape[1]

    # One common padded feature width for every conv activation / weight slot.
    f_pad = max(max(w.shape[0] for w in conv_ws), max(w.shape[1] for w in conv_ws))
    fc_in = max(w.shape[0] for w, _ in fcs)
    fc_out = max(w.shape[1] for w, _ in fcs)

    # Pack all conv weights into one zero-padded slab; same for the FC head.
    cw = jnp.zeros((n_conv, f_pad, f_pad), jnp.float32)
    for i, w in enumerate(conv_ws):
        cw = cw.at[i, :w.shape[0], :w.shape[1]].set(w)
    fw = jnp.zeros((n_fc, fc_in, fc_out), jnp.float32)
    fb = jnp.zeros((n_fc, 1, fc_out), jnp.float32)
    for i, (w, b) in enumerate(fcs):
        fw = fw.at[i, :w.shape[0], :w.shape[1]].set(w)
        fb = fb.at[i, :, :b.shape[1]].set(b)

    x_pad = jnp.pad(x, ((0, 0), (0, 0), (0, f_pad - in_size)))

    flops = B * (n_conv * (2 * N * N * f_pad + 2 * N * f_pad * f_pad)
                 + n_fc * 2 * fc_in * fc_out)
    bytes_accessed = 4 * (G.size + x_pad.size + mask.size
                          + cw.size + fw.size + fb.size + B * out_size)

    kernel = make_net_kernel(n_conv, n_masked, n_fc, out_size)
    out = pl.pallas_call(
        kernel,
        out_shape=jax.ShapeDtypeStruct((B, 1, out_size), jnp.float32),
        grid=(B,),
        in_specs=[
            pl.BlockSpec((1, N, N), lambda b: (b, 0, 0)),          # G  (per graph)
            pl.BlockSpec((1, N, f_pad), lambda b: (b, 0, 0)),      # x  (per graph)
            pl.BlockSpec((1, N, 1), lambda b: (b, 0, 0)),          # mask (per graph)
            pl.BlockSpec((n_conv, f_pad, f_pad), lambda b: (0, 0, 0)),  # conv slab (resident)
            pl.BlockSpec((n_fc, fc_in, fc_out), lambda b: (0, 0, 0)),   # fc W slab  (resident)
            pl.BlockSpec((n_fc, 1, fc_out), lambda b: (0, 0, 0)),       # fc b slab  (resident)
        ],
        out_specs=pl.BlockSpec((1, 1, out_size), lambda b: (b, 0, 0)),
        compiler_params=pltpu.CompilerParams(
            dimension_semantics=("parallel",),          # shards graphs across v7x TCs
            vmem_limit_bytes=32 * 1024 * 1024),
        cost_estimate=pl.CostEstimate(
            flops=int(flops), transcendentals=0, bytes_accessed=int(bytes_accessed)),
    )(G, x_pad, mask, cw, fw, fb)

    side_loss = 0.0                          # hpool_arch is None -> identity
    return out[:, 0, :], side_loss


# ------------------------------ pure-JAX reference ----------------------------
def ref_forward(params, x, G, mask):
    def gin(h, m, W):
        agg = jnp.einsum("bij,bjf->bif", G, h) + h
        z = jnp.maximum(agg @ W, 0.0)
        return z * m if m is not None else z

    h = x
    for W in params["conv1"]:
        h = gin(h, mask, W)
    for W in params["conv2"]:
        h = gin(h, mask, W)
    for W in params["conv3"]:
        h = gin(h, None, W)
    pooled = jnp.mean(h, axis=1)
    z = jnp.maximum(pooled @ params["fc1_w"] + params["fc1_b"], 0.0)
    z = jnp.maximum(z @ params["fc2_w"] + params["fc2_b"], 0.0)
    return z @ params["out_w"] + params["out_b"], 0.0


# ------------------------------------ main -------------------------------------
def glorot(key, shape):
    fan_in, fan_out = shape[-2], shape[-1]
    scale = jnp.sqrt(2.0 / (fan_in + fan_out)).astype(jnp.float32)
    return scale * jax.random.normal(key, shape, dtype=jnp.float32)


if __name__ == "__main__":
    key = jax.random.PRNGKey(0)
    B, N = 2, 16                 # batch, nodes (g_size = N)
    in_size, out_size = 8, 4

    keys = jax.random.split(key, 12)

    # deterministic inputs
    x = jax.random.normal(keys[0], (B, N, in_size), dtype=jnp.float32)
    A = (jax.random.uniform(keys[1], (B, N, N)) > 0.7).astype(jnp.float32)
    G = jnp.maximum(A, jnp.swapaxes(A, 1, 2))                     # symmetric adjacency
    valid = jnp.array([N, N - 4])                                 # second graph is padded
    mask = (jnp.arange(N)[None, :] < valid[:, None]).astype(jnp.float32)[..., None]
    x = x * mask

    # deterministic parameters (shapes follow the chosen config)
    params = {
        # conv_before1: hidden_size=[16, 16], bias=False
        "conv1": [glorot(keys[2], (in_size, 16)), glorot(keys[3], (16, 16))],
        # conv_before2: hidden_size=[16]
        "conv2": [glorot(keys[4], (16, 16))],
        # conv_after1: hidden_size=[32]
        "conv3": [glorot(keys[5], (16, 32))],
        # fclayers: [{'out_size': 32}, {'out_size': 16}]
        "fc1_w": glorot(keys[6], (32, 32)), "fc1_b": 0.01 * jnp.ones((1, 32), jnp.float32),
        "fc2_w": glorot(keys[7], (32, 16)), "fc2_b": 0.01 * jnp.ones((1, 16), jnp.float32),
        # out_layers: Linear(16, out_size)
        "out_w": glorot(keys[8], (16, out_size)),
        "out_b": 0.01 * jnp.ones((1, out_size), jnp.float32),
    }

    out, side_loss = net_forward(params, x, G, mask)
    out = jax.block_until_ready(out)

    ref_out, _ = ref_forward(params, x, G, mask)
    assert out.shape == (B, out_size)
    assert jnp.allclose(out, ref_out, rtol=1e-3, atol=1e-3), "mismatch vs reference"

    print("KERNEL_OK")
</pallas_src>

<mosaic_0001>
module attributes {stable_mosaic.version = 11 : i64} {
  func.func @kernel(%arg0: i32, %arg1: memref<1x16x16xf32, #tpu.memory_space<vmem>>, %arg2: memref<1x16x32xf32, #tpu.memory_space<vmem>>, %arg3: memref<1x16x1xf32, #tpu.memory_space<vmem>>, %arg4: memref<4x32x32xf32, #tpu.memory_space<vmem>>, %arg5: memref<3x32x32xf32, #tpu.memory_space<vmem>>, %arg6: memref<3x1x32xf32, #tpu.memory_space<vmem>>, %arg7: memref<1x1x4xf32, #tpu.memory_space<vmem>>) attributes {dimension_semantics = [#tpu.dimension_semantics<parallel>], iteration_bounds = array<i64: 2>, scalar_prefetch = 0 : i64, scratch_operands = 0 : i64, tpu.core_type = #tpu.core_type<tc>, window_params = [{transform_indices = @transform_0, window_bounds = array<i64: 1, 16, 16>}, {transform_indices = @transform_1, window_bounds = array<i64: 1, 16, 32>}, {transform_indices = @transform_2, window_bounds = array<i64: 1, 16, 1>}, {pipeline_mode = #tpu.pipeline_mode<synchronous>, transform_indices = @transform_3, window_bounds = array<i64: 4, 32, 32>}, {pipeline_mode = #tpu.pipeline_mode<synchronous>, transform_indices = @transform_4, window_bounds = array<i64: 3, 32, 32>}, {pipeline_mode = #tpu.pipeline_mode<synchronous>, transform_indices = @transform_5, window_bounds = array<i64: 3, 1, 32>}, {transform_indices = @transform_6, window_bounds = array<i64: 1, 1, 4>}]} {
    %c0 = arith.constant 0 : index
    %c0_0 = arith.constant 0 : index
    %c0_1 = arith.constant 0 : index
    %0 = vector.load %arg1[%c0, %c0_0, %c0_1] : memref<1x16x16xf32, #tpu.memory_space<vmem>>, vector<1x16x16xf32>
    %1 = vector.shape_cast %0 : vector<1x16x16xf32> to vector<16x16xf32>
    %c0_2 = arith.constant 0 : index
    %c0_3 = arith.constant 0 : index
    %c0_4 = arith.constant 0 : index
    %2 = vector.load %arg2[%c0_2, %c0_3, %c0_4] : memref<1x16x32xf32, #tpu.memory_space<vmem>>, vector<1x16x32xf32>
    %3 = vector.shape_cast %2 : vector<1x16x32xf32> to vector<16x32xf32>
    %c0_5 = arith.constant 0 : index
    %c0_6 = arith.constant 0 : index
    %c0_7 = arith.constant 0 : index
    %4 = vector.load %arg3[%c0_5, %c0_6, %c0_7] : memref<1x16x1xf32, #tpu.memory_space<vmem>>, vector<1x16x1xf32>
    %5 = vector.shape_cast %4 : vector<1x16x1xf32> to vector<16x1xf32>
    %6 = tpu.iota {dimensions = array<i32: 0>} : vector<16x16xi32>
    %7 = tpu.iota {dimensions = array<i32: 1>} : vector<16x16xi32>
    %8 = arith.cmpi eq, %6, %7 : vector<16x16xi32>
    %9 = arith.extui %8 : vector<16x16xi1> to vector<16x16xi32>
    %10 = arith.sitofp %9 : vector<16x16xi32> to vector<16x16xf32>
    %11 = arith.addf %1, %10 : vector<16x16xf32>
    %12 = vector.broadcast %5 : vector<16x1xf32> to vector<16x16xf32>
    %13 = arith.mulf %11, %12 : vector<16x16xf32>
    %cst = arith.constant dense<0.000000e+00> : vector<16x32xf32>
    %14 = tpu.matmul %13, %3, %cst {dimension_numbers = #tpu.dot_dimension_numbers<[1], [0], [0], [1], [0, 0, 1, 1], [], []>} : vector<16x16xf32>, vector<16x32xf32>, vector<16x32xf32> -> vector<16x32xf32>
    %c0_8 = arith.constant 0 : index
    %c0_9 = arith.constant 0 : index
    %c0_10 = arith.constant 0 : index
    %15 = vector.load %arg4[%c0_8, %c0_9, %c0_10] : memref<4x32x32xf32, #tpu.memory_space<vmem>>, vector<1x32x32xf32>
    %16 = vector.shape_cast %15 : vector<1x32x32xf32> to vector<32x32xf32>
    %cst_11 = arith.constant dense<0.000000e+00> : vector<16x32xf32>
    %17 = tpu.matmul %14, %16, %cst_11 {dimension_numbers = #tpu.dot_dimension_numbers<[1], [0], [0], [1], [0, 0, 1, 1], [], []>} : vector<16x32xf32>, vector<32x32xf32>, vector<16x32xf32> -> vector<16x32xf32>
    %cst_12 = arith.constant 0.000000e+00 : f32
    %18 = vector.broadcast %cst_12 : f32 to vector<16x32xf32>
    %19 = arith.maximumf %17, %18 : vector<16x32xf32>
    %cst_13 = arith.constant dense<0.000000e+00> : vector<16x32xf32>
    %20 = tpu.matmul %13, %19, %cst_13 {dimension_numbers = #tpu.dot_dimension_numbers<[1], [0], [0], [1], [0, 0, 1, 1], [], []>} : vector<16x16xf32>, vector<16x32xf32>, vector<16x32xf32> -> vector<16x32xf32>
    %c1 = arith.constant 1 : index
    %c0_14 = arith.constant 0 : index
    %c0_15 = arith.constant 0 : index
    %21 = vector.load %arg4[%c1, %c0_14, %c0_15] : memref<4x32x32xf32, #tpu.memory_space<vmem>>, vector<1x32x32xf32>
    %22 = vector.shape_cast %21 : vector<1x32x32xf32> to vector<32x32xf32>
    %cst_16 = arith.constant dense<0.000000e+00> : vector<16x32xf32>
    %23 = tpu.matmul %20, %22, %cst_16 {dimension_numbers = #tpu.dot_dimension_numbers<[1], [0], [0], [1], [0, 0, 1, 1], [], []>} : vector<16x32xf32>, vector<32x32xf32>, vector<16x32xf32> -> vector<16x32xf32>
    %cst_17 = arith.constant 0.000000e+00 : f32
    %24 = vector.broadcast %cst_17 : f32 to vector<16x32xf32>
    %25 = arith.maximumf %23, %24 : vector<16x32xf32>
    %cst_18 = arith.constant dense<0.000000e+00> : vector<16x32xf32>
    %26 = tpu.matmul %13, %25, %cst_18 {dimension_numbers = #tpu.dot_dimension_numbers<[1], [0], [0], [1], [0, 0, 1, 1], [], []>} : vector<16x16xf32>, vector<16x32xf32>, vector<16x32xf32> -> vector<16x32xf32>
    %c2 = arith.constant 2 : index
    %c0_19 = arith.constant 0 : index
    %c0_20 = arith.constant 0 : index
    %27 = vector.load %arg4[%c2, %c0_19, %c0_20] : memref<4x32x32xf32, #tpu.memory_space<vmem>>, vector<1x32x32xf32>
    %28 = vector.shape_cast %27 : vector<1x32x32xf32> to vector<32x32xf32>
    %cst_21 = arith.constant dense<0.000000e+00> : vector<16x32xf32>
    %29 = tpu.matmul %26, %28, %cst_21 {dimension_numbers = #tpu.dot_dimension_numbers<[1], [0], [0], [1], [0, 0, 1, 1], [], []>} : vector<16x32xf32>, vector<32x32xf32>, vector<16x32xf32> -> vector<16x32xf32>
    %cst_22 = arith.constant 0.000000e+00 : f32
    %30 = vector.broadcast %cst_22 : f32 to vector<16x32xf32>
    %31 = arith.maximumf %29, %30 : vector<16x32xf32>
    %cst_23 = arith.constant dense<0.000000e+00> : vector<16x32xf32>
    %32 = tpu.matmul %11, %31, %cst_23 {dimension_numbers = #tpu.dot_dimension_numbers<[1], [0], [0], [1], [0, 0, 1, 1], [], []>} : vector<16x16xf32>, vector<16x32xf32>, vector<16x32xf32> -> vector<16x32xf32>
    %c3 = arith.constant 3 : index
    %c0_24 = arith.constant 0 : index
    %c0_25 = arith.constant 0 : index
    %33 = vector.load %arg4[%c3, %c0_24, %c0_25] : memref<4x32x32xf32, #tpu.memory_space<vmem>>, vector<1x32x32xf32>
    %34 = vector.shape_cast %33 : vector<1x32x32xf32> to vector<32x32xf32>
    %cst_26 = arith.constant dense<0.000000e+00> : vector<16x32xf32>
    %35 = tpu.matmul %32, %34, %cst_26 {dimension_numbers = #tpu.dot_dimension_numbers<[1], [0], [0], [1], [0, 0, 1, 1], [], []>} : vector<16x32xf32>, vector<32x32xf32>, vector<16x32xf32> -> vector<16x32xf32>
    %cst_27 = arith.constant 0.000000e+00 : f32
    %36 = vector.broadcast %cst_27 : f32 to vector<16x32xf32>
    %37 = arith.maximumf %35, %36 : vector<16x32xf32>
    %cst_28 = arith.constant dense<0.000000e+00> : vector<32xf32>
    %38 = vector.multi_reduction <add>, %37, %cst_28 [0] : vector<16x32xf32> to vector<32xf32>
    %39 = vector.shape_cast %38 : vector<32xf32> to vector<1x32xf32>
    %cst_29 = arith.constant 1.600000e+01 : f32
    %40 = vector.broadcast %cst_29 : f32 to vector<1x32xf32>
    %41 = arith.divf %39, %40 : vector<1x32xf32>
    %c0_30 = arith.constant 0 : index
    %c0_31 = arith.constant 0 : index
    %c0_32 = arith.constant 0 : index
    %42 = vector.load %arg5[%c0_30, %c0_31, %c0_32] : memref<3x32x32xf32, #tpu.memory_space<vmem>>, vector<1x32x32xf32>
    %43 = vector.shape_cast %42 : vector<1x32x32xf32> to vector<32x32xf32>
    %cst_33 = arith.constant dense<0.000000e+00> : vector<1x32xf32>
    %44 = tpu.matmul %41, %43, %cst_33 {dimension_numbers = #tpu.dot_dimension_numbers<[1], [0], [0], [1], [0, 0, 1, 1], [], []>} : vector<1x32xf32>, vector<32x32xf32>, vector<1x32xf32> -> vector<1x32xf32>
    %c0_34 = arith.constant 0 : index
    %c0_35 = arith.constant 0 : index
    %c0_36 = arith.constant 0 : index
    %45 = vector.load %arg6[%c0_34, %c0_35, %c0_36] : memref<3x1x32xf32, #tpu.memory_space<vmem>>, vector<1x1x32xf32>
    %46 = vector.shape_cast %45 : vector<1x1x32xf32> to vector<1x32xf32>
    %47 = arith.addf %44, %46 : vector<1x32xf32>
    %cst_37 = arith.constant 0.000000e+00 : f32
    %48 = vector.broadcast %cst_37 : f32 to vector<1x32xf32>
    %49 = arith.maximumf %47, %48 : vector<1x32xf32>
    %c1_38 = arith.constant 1 : index
    %c0_39 = arith.constant 0 : index
    %c0_40 = arith.constant 0 : index
    %50 = vector.load %arg5[%c1_38, %c0_39, %c0_40] : memref<3x32x32xf32, #tpu.memory_space<vmem>>, vector<1x32x32xf32>
    %51 = vector.shape_cast %50 : vector<1x32x32xf32> to vector<32x32xf32>
    %cst_41 = arith.constant dense<0.000000e+00> : vector<1x32xf32>
    %52 = tpu.matmul %49, %51, %cst_41 {dimension_numbers = #tpu.dot_dimension_numbers<[1], [0], [0], [1], [0, 0, 1, 1], [], []>} : vector<1x32xf32>, vector<32x32xf32>, vector<1x32xf32> -> vector<1x32xf32>
    %c1_42 = arith.constant 1 : index
    %c0_43 = arith.constant 0 : index
    %c0_44 = arith.constant 0 : index
    %53 = vector.load %arg6[%c1_42, %c0_43, %c0_44] : memref<3x1x32xf32, #tpu.memory_space<vmem>>, vector<1x1x32xf32>
    %54 = vector.shape_cast %53 : vector<1x1x32xf32> to vector<1x32xf32>
    %55 = arith.addf %52, %54 : vector<1x32xf32>
    %cst_45 = arith.constant 0.000000e+00 : f32
    %56 = vector.broadcast %cst_45 : f32 to vector<1x32xf32>
    %57 = arith.maximumf %55, %56 : vector<1x32xf32>
    %c2_46 = arith.constant 2 : index
    %c0_47 = arith.constant 0 : index
    %c0_48 = arith.constant 0 : index
    %58 = vector.load %arg5[%c2_46, %c0_47, %c0_48] : memref<3x32x32xf32, #tpu.memory_space<vmem>>, vector<1x32x32xf32>
    %59 = vector.shape_cast %58 : vector<1x32x32xf32> to vector<32x32xf32>
    %cst_49 = arith.constant dense<0.000000e+00> : vector<1x32xf32>
    %60 = tpu.matmul %57, %59, %cst_49 {dimension_numbers = #tpu.dot_dimension_numbers<[1], [0], [0], [1], [0, 0, 1, 1], [], []>} : vector<1x32xf32>, vector<32x32xf32>, vector<1x32xf32> -> vector<1x32xf32>
    %c2_50 = arith.constant 2 : index
    %c0_51 = arith.constant 0 : index
    %c0_52 = arith.constant 0 : index
    %61 = vector.load %arg6[%c2_50, %c0_51, %c0_52] : memref<3x1x32xf32, #tpu.memory_space<vmem>>, vector<1x1x32xf32>
    %62 = vector.shape_cast %61 : vector<1x1x32xf32> to vector<1x32xf32>
    %63 = arith.addf %60, %62 : vector<1x32xf32>
    %64 = vector.extract_strided_slice %63 {offsets = [0, 0], sizes = [1, 4], strides = [1, 1]} : vector<1x32xf32> to vector<1x4xf32>
    %c0_53 = arith.constant 0 : index
    %c0_54 = arith.constant 0 : index
    %c0_55 = arith.constant 0 : index
    %65 = vector.load %arg7[%c0_53, %c0_54, %c0_55] : memref<1x1x4xf32, #tpu.memory_space<vmem>>, vector<1x1x4xf32>
    %66 = vector.shape_cast %65 : vector<1x1x4xf32> to vector<1x4xf32>
    %67 = vector.shape_cast %64 : vector<1x4xf32> to vector<1x1x4xf32>
    tpu.vector_store %arg7[%c0_53, %c0_54, %c0_55], %67 {strides = array<i32>} : memref<1x1x4xf32, #tpu.memory_space<vmem>>, vector<1x1x4xf32>,
    return
  }
  func.func @transform_0(%arg0: i32) -> (i32, i32, i32) {
    %c0_i32 = arith.constant 0 : i32
    %c0_i32_0 = arith.constant 0 : i32
    %c0_i32_1 = arith.constant 0 : i32
    return %arg0, %c0_i32, %c0_i32_0 : i32, i32, i32
  }
  func.func @transform_1(%arg0: i32) -> (i32, i32, i32) {
    %c0_i32 = arith.constant 0 : i32
    %c0_i32_0 = arith.constant 0 : i32
    %c0_i32_1 = arith.constant 0 : i32
    return %arg0, %c0_i32, %c0_i32_0 : i32, i32, i32
  }
  func.func @transform_2(%arg0: i32) -> (i32, i32, i32) {
    %c0_i32 = arith.constant 0 : i32
    %c0_i32_0 = arith.constant 0 : i32
    %c0_i32_1 = arith.constant 0 : i32
    return %arg0, %c0_i32, %c0_i32_0 : i32, i32, i32
  }
  func.func @transform_3(%arg0: i32) -> (i32, i32, i32) {
    %c0_i32 = arith.constant 0 : i32
    %c0_i32_0 = arith.constant 0 : i32
    %c0_i32_1 = arith.constant 0 : i32
    %c0_i32_2 = arith.constant 0 : i32
    return %c0_i32, %c0_i32_0, %c0_i32_1 : i32, i32, i32
  }
  func.func @transform_4(%arg0: i32) -> (i32, i32, i32) {
    %c0_i32 = arith.constant 0 : i32
    %c0_i32_0 = arith.constant 0 : i32
    %c0_i32_1 = arith.constant 0 : i32
    %c0_i32_2 = arith.constant 0 : i32
    return %c0_i32, %c0_i32_0, %c0_i32_1 : i32, i32, i32
  }
  func.func @transform_5(%arg0: i32) -> (i32, i32, i32) {
    %c0_i32 = arith.constant 0 : i32
    %c0_i32_0 = arith.constant 0 : i32
    %c0_i32_1 = arith.constant 0 : i32
    %c0_i32_2 = arith.constant 0 : i32
    return %c0_i32, %c0_i32_0, %c0_i32_1 : i32, i32, i32
  }
  func.func @transform_6(%arg0: i32) -> (i32, i32, i32) {
    %c0_i32 = arith.constant 0 : i32
    %c0_i32_0 = arith.constant 0 : i32
    %c0_i32_1 = arith.constant 0 : i32
    return %arg0, %c0_i32, %c0_i32_0 : i32, i32, i32
  }
}

</mosaic_0001>

<bundles_post_ra>
// kernel: tpu_custom_call.1
= control target key start
LH: loop header
LB: loop body
LE: loop exit
PB: predicated region body
PF: predicated region fallthrough
CT: control target
= control target key end

     0   :  { %11 = vsyncpa [#allocation3], 0  ;;  %s2249_s0 = inlined_call_operand.vmem [shape: f32[2,16,16], index: 0, kind: input, shape index: {}]   ;;  %s2250_s1 = inlined_call_operand.hbm [shape: f32[2,16,32], index: 1, kind: input, shape index: {}]   ;;  %s2251_s2 = inlined_call_operand.vmem [shape: f32[2,16,1], index: 2, kind: input, shape index: {}]   ;;  %s2252_s3 = inlined_call_operand.hbm [shape: f32[4,32,32], index: 3, kind: input, shape index: {}]   ;;  %s2253_s4 = inlined_call_operand.hbm [shape: f32[3,32,32], index: 4, kind: input, shape index: {}]   ;;  %s2254_s5 = inlined_call_operand.vmem [shape: f32[3,1,32], index: 5, kind: input, shape index: {}]   ;;  %s2255_s6 = inlined_call_operand.hbm [shape: f32[2,1,4], index: 6, kind: output, shape index: {}]  }
   0x1   :  { %13 = vsyncpa [#allocation3 + $0x1], 0 }
   0x2   :  { %14 = vsyncpa [#allocation6], 0 }
   0x3   :  { %15 = vsyncpa [#allocation4], 0 }
   0x4   :  { %17 = vsyncpa [#allocation4 + $0x1], 0  ;;  %s1957_s21 = smov 0   ;;  %s1959_s22 = smov 0  }
   0x5   :  { %s1961_s23 = smov 0   ;;  %s1963_s24 = smov 0  }
   0x6 LB: > { %s1978_s25 = sadd.s32 4294967295, %s1910_s24   ;;  %s1409_s26 = sadd.s32 4294967294, %s1910_s24   ;;  %s1910_s24 = sphi %s1963_s24, %s2275_s24   ;;  %s1906_s23 = sphi %s1961_s23, %s2274_s23   ;;  %s1902_s22 = sphi %s1959_s22, %s2273_s22   ;;  %s1898_s21 = sphi %s1957_s21, %s2272_s21  }
   0x7   : > { %p69_p0 = scmp.ne.s32.totalorder %s1902_s22, %s1898_s21  ;;  %p2256_p1 = scmp.eq.s32.totalorder %s1978_s25, 0 }
   0x8   : > { %p188_p3 = scmp.eq.s32.totalorder %s1409_s26, 1  ;;  %p1410_p5 = scmp.ge.s32.totalorder %s1910_s24, 1 }
   0x9   : > { %p1987_p4 = por %p2256_p1, %p69_p0  ;;  %p195_p7 = scmp.lt.s32.totalorder %s1910_s24, 3 }
   0xa   : > { %p1992_p6 = por %p188_p3, %p69_p0  ;;  %s1912_s30 = smov [#allocation5]  }
   0xb   : > { %s2259_s27 = scalar_select %p1987_p4, 1, 0 }
   0xc   : > { %s2260_s28 = scalar_select %p1992_p6, 1, 0 }
   0xd   : > { %p1997_p8 = pnand %p1410_p5, %p195_p7  ;;  %s207_s7 = sshll.u32 %s1912_s30, 4  ;;  %s2001_s7 = int_to_ptr.vmem [resolvable:$true] %s207_s7 }
   0xe   : > { %s1913_s9 = smov [#allocation7]   ;;  %s1754_s13 = scalar_lea.hbm %s2252_s3, 2048 }
   0xf   : > { %p1692_p9 = pneg %p1997_p8  ;;  %s220_s10 = sshll.u32 %s1913_s9, 4  ;;  %s2012_s10 = int_to_ptr.vmem [resolvable:$true] %s220_s10 }
  0x10   : > { %p1755_p12 = scmp.ne.s32.totalorder %s2252_s3, %s1754_s13  ;;  %p1761_p5 = scmp.lt.u32.totalorder %s1754_s13, %s2252_s3 }
  0x11   : > { %p2008_p11 = pnand %p1692_p9, %p2256_p1 }
  0x13   : > { %p1756_p13 = pneg %p2008_p11 }
  0x15   : > { %p1757_p0 = pnand %p1756_p13, %p1755_p12 }
  0x17   : > { %p1758_p3 = pneg %p1757_p0 }
  0x19   : > { %p1763_p7 = pnand %p1761_p5, %p1758_p3 }
  0x1b   : > { %1766 = shalt.err (!%p1763_p7)
}
  0x1c   : > { %s1767_s18 = scalar_lea.vmem %s2001_s7, 2048  ;;  %p1775_p2 = scmp.lt.s32.totalorder %s2001_s7, %s2001_s7 }
  0x1d   : > { %p1768_p9 = scmp.ne.s32.totalorder %s2001_s7, %s1767_s18  ;;  %p1776_p12 = scmp.lt.s32.totalorder %s1767_s18, %s1767_s18 }
  0x1f   : > { %p1770_p10 = pnand %p1768_p9, %p1756_p13  ;;  %p1777_p0 = por %p1776_p12, %p1775_p2 }
  0x21   : > { %p1771_p1 = pneg %p1770_p10 }
  0x23   : > { %p1778_p6 = pnand %p1777_p0, %p1771_p1 }
  0x25   : > { %1781 = shalt.err (!%p1778_p6)
}
  0x26   : > { %s1914_s19 = smov 128   ;;  %s1915_s20 = smov 8  }
  0x27   : > { %1695 = dma.hbm_to_vmem [thread:$0]  (!%p2008_p11), %s2252_s3, 2048, %s2001_s7, [#allocation6], %s1914_s19, %s1914_s19, %s1915_s20  }
  0x28   : > { %s1782_s12 = scalar_lea.hbm %s2253_s4, 1536 }
  0x29   : > { %p1783_p1 = scmp.ne.s32.totalorder %s2253_s4, %s1782_s12  ;;  %p1789_p10 = scmp.lt.u32.totalorder %s1782_s12, %s2253_s4 }
  0x2b   : > { %p1785_p2 = pnand %p1783_p1, %p1756_p13 }
  0x2d   : > { %p1786_p6 = pneg %p1785_p2 }
  0x2f   : > { %p1791_p3 = pnand %p1789_p10, %p1786_p6 }
  0x31   : > { %1794 = shalt.err (!%p1791_p3)
}
  0x32   : > { %s1795_s7 = scalar_lea.vmem %s2012_s10, 1536  ;;  %p1803_p12 = scmp.lt.s32.totalorder %s2012_s10, %s2012_s10 }
  0x33   : > { %p1796_p5 = scmp.ne.s32.totalorder %s2012_s10, %s1795_s7  ;;  %p1804_p0 = scmp.lt.s32.totalorder %s1795_s7, %s1795_s7 }
  0x35   : > { %p1798_p7 = pnand %p1796_p5, %p1756_p13  ;;  %p1805_p1 = por %p1804_p0, %p1803_p12 }
  0x37   : > { %p1799_p9 = pneg %p1798_p7 }
  0x39   : > { %p1806_p2 = pnand %p1805_p1, %p1799_p9 }
  0x3b   : > { %1809 = shalt.err (!%p1806_p2)
}
  0x3c   : > { %1698 = dma.hbm_to_vmem [thread:$0]  (!%p2008_p11), %s2253_s4, 1536, %s2012_s10, [#allocation6], %s1914_s19, %s1914_s19, %s1915_s20  }
  0x3d   : > { %s2073_s8 = sadd.s32 1, %s1910_s24   ;;  %s56_s26 = sadd.s32 1, %s1906_s23 }
  0x3e   : > { %s53_s30 = ssub.s32 %s1910_s24, %s2073_s8  ;;  %p63_p13 = scmp.ne.s32.totalorder %s1906_s23, %s1902_s22 }
  0x3f   : > { %p54_p6 = scmp.eq.s32.totalorder %s53_s30, 0  ;;  %p64_p10 = scmp.eq.s32.totalorder %s1910_s24, 0 }
  0x40   : > { %p2263_p3 = scmp.eq.s32.totalorder %s1978_s25, 1  ;;  %p1709_p7 = scmp.lt.s32.totalorder %s1910_s24, 2 }
  0x41   : > { %s2089_s11 = scalar_select %p54_p6, %s1906_s23, %s56_s26  }
  0x42   : > { %p2083_p5 = por %p2263_p3, %p63_p13  ;;  %p65_p9 = por %p64_p10, %p63_p13 }
  0x43   : > { %s245_s12 = sand.u32 1, %s1906_s23   ;;  %s1451_s10 = sshll.u32 %s1910_s24, 8 }
  0x44   : > { %s2264_s9 = scalar_select %p2083_p5, 1, 0 }
  0x45   : > { %s1414_s13 = sshll.u32 %s245_s12, 4  ;;  %s2096_s16 = scalar_lea.hbm %s2250_s1, %s1451_s10 }
  0x46   : > { %s249_s7 = scalar_lea.vmem [#allocation2], %s1414_s13  ;;  %p2100_p11 = pnand %p1709_p7, %p65_p9 }
  0x47   : > { %s256_s17 = sshll.u32 %s249_s7, 4  ;;  %s2104_s26 = scalar_lea.sflag [#allocation3], %s245_s12  ;;  %s2098_s17 = int_to_ptr.vmem [resolvable:$true] %s256_s17 }
  0x48   : > { %s1810_s30 = scalar_lea.hbm %s2096_s16, 256  ;;  %p1812_p0 = pneg %p2100_p11 }
  0x49   : > { %p1811_p12 = scmp.ne.s32.totalorder %s2096_s16, %s1810_s30  ;;  %s1815_s14 = scalar_lea.hbm %s2250_s1, 512 }
  0x4a   : > { %p1816_p13 = scmp.lt.u32.totalorder %s2096_s16, %s2250_s1  ;;  %p1817_p6 = scmp.lt.u32.totalorder %s1815_s14, %s1810_s30 }
  0x4b   : > { %p1813_p1 = pnand %p1812_p0, %p1811_p12  ;;  %p1819_p3 = scmp.lt.u32.totalorder %s1810_s30, %s2096_s16 }
  0x4c   : > { %p1818_p10 = por %p1817_p6, %p1816_p13 }
  0x4d   : > { %p1814_p2 = pneg %p1813_p1 }
  0x4e   : > { %p1820_p7 = por %p1819_p3, %p1818_p10 }
  0x50   : > { %p1821_p9 = pnand %p1820_p7, %p1814_p2 }
  0x52   : > { %1824 = shalt.err (!%p1821_p9)
}
  0x53   : > { %s1825_s12 = scalar_lea.vmem %s2098_s17, 256  ;;  %s1916_s13 = smov [#allocation2]  }
  0x54   : > { %p1826_p12 = scmp.ne.s32.totalorder %s2098_s17, %s1825_s12  ;;  %s1830_s10 = sshll.u32 %s1916_s13, 4  ;;  %s1831_s10 = int_to_ptr.vmem [resolvable:$false] %s1830_s10 }
  0x55   : > { %s1832_s15 = scalar_lea.vmem %s1831_s10, 512  ;;  %p1833_p4 = scmp.lt.s32.totalorder %s2098_s17, %s1831_s10 }
  0x56   : > { %p1828_p1 = pnand %p1826_p12, %p1812_p0  ;;  %p1834_p13 = scmp.lt.s32.totalorder %s1832_s15, %s1825_s12 }
  0x58   : > { %p1829_p5 = pneg %p1828_p1  ;;  %p1835_p6 = por %p1834_p13, %p1833_p4 }
  0x5a   : > { %p1836_p10 = pnand %p1835_p6, %p1829_p5 }
  0x5c   : > { %1839 = shalt.err (!%p1836_p10)
}
  0x5d   : > { %1702 = dma.hbm_to_vmem [thread:$0]  (!%p2100_p11), %s2096_s16, 256, %s2098_s17, %s2104_s26, %s1914_s19, %s1914_s19, %s1915_s20  }
  0x5e   : > { %276 = sbr.rel (%p1997_p8) target bundleno = 2657 (0xa61), region = 44  ;;  %s2138_s30 = sand.u32 (!%p1997_p8), 1, %s1902_s22  }
  0x5f   : > { %s1418_s14 = sshll.u32 (!%p1997_p8), %s2138_s30, 4  ;;  %s279_s7 = scalar_lea.sflag (!%p1997_p8), [#allocation3], %s2138_s30 }
  0x60   : > { %s282_s12 = scalar_lea.vmem (!%p1997_p8), [#allocation2], %s1418_s14  ;;  %p2266_p4 = scmp.ne.s32.totalorder (!%p1997_p8), %s2259_s27, 0 }
  0x65   : > { %1885 = dma.done.wait (%p2266_p4), %s279_s7, 256  }
  0x66   : > { %1887 = vsyncadd (%p2266_p4), %s279_s7, 4294967040  ;;  %p2267_p5 = scmp.eq.s32.totalorder %s1978_s25, 0 }
  0x68   : > { %1889 = dma.done.wait (%p2267_p5), [#allocation6], 3584   ;;  %p2268_p11 = pmov %p2267_p5 }
  0x69   : > { %p328_p8 = scmp.lt.s32.totalorder %s1978_s25, 1  ;;  %v1917_v0 = vmov 0   ;;  %v340_v2 = vld [vmem:[%s282_s12] sm:$0xff]  ;;  %v341_v3 = vld [vmem:[%s282_s12 + $0x8] sm:$0xff]  ;;  %v344_v12 = vlaneseq  ;;  %v1918_v16 = vmov 0.0   ;;  %vm369_vm2 = vcmask 130048  }
  0x6a   : > { %1891 = vsyncadd (%p2268_p11), [#allocation6], 4294963712  ;;  %1753 = vset.pattern.permute.xlu0 %v1917_v0  ;;  %v1614_v5 = vpack.c.bf16 %v341_v3, %v340_v2  ;;  %v451_v6 = vld [vmem:[#allocation5] sm:$0xff]  ;;  %v452_v7 = vld [vmem:[#allocation5 + $0x8] sm:$0xff]  ;;  %vm455_vm3 = vcmask 261120   ;;  %vm1920_vm4 = vmmov 0  }
  0x6b   : > { %s329_s29 = scalar_select %p328_p8, %s1978_s25, 1  ;;  %v453_v8 = vld [vmem:[#allocation5 + $0x10] sm:$0xff]  ;;  %v1618_v9 = vpack.c.bf16 %v452_v7, %v451_v6  ;;  %v454_v10 = vld [vmem:[#allocation5 + $0x18] sm:$0xff]  ;;  %v345_v13 = vshrl.u32 %v344_v12, 7  ;;  %v348_v14 = vand.u32 127, %v344_v12  ;;  %v615_v32 = vld [vmem:[#allocation5 + $0x20] sm:$0xff] }
  0x6c   : > { %1615 = vmatprep.subr.bf16.mxu0 %v1614_v5  ;;  %v1622_v11 = vpack.c.bf16 %v454_v10, %v453_v8  ;;  %v616_v33 = vld [vmem:[#allocation5 + $0x28] sm:$0xff]  ;;  %v617_v37 = vld [vmem:[#allocation5 + $0x30] sm:$0xff]  ;;  %v618_v38 = vld [vmem:[#allocation5 + $0x38] sm:$0xff]  ;;  %v1919_v7 = vmov 0.0|0.0   ;;  %vm1285_vm5 = vcmask 24576   ;;  %s1288_s18 = scalar_lea.sflag [#allocation4], %s2138_s30 }
  0x6d   : > { %s1452_s19 = sshll.u32 %s329_s29, 4  ;;  %1617 = vmatpush3.bf16.msra.mxu0 %v1614_v5  ;;  %1619 = vmatprep.subr.bf16.mxu1 %v1618_v9  ;;  %vm349_vm0 = vcmp.eq.s32.totalorder %v345_v13, %v348_v14  ;;  %v346_v15 = vadd.s32 8, %v345_v13  ;;  %v1630_v36 = vpack.c.bf16 %v616_v33, %v615_v32  ;;  %v1634_v39 = vpack.c.bf16 %v618_v38, %v617_v37  ;;  %v778_v45 = vld [vmem:[#allocation5 + $0x40] sm:$0xff]  ;;  %v779_v46 = vld [vmem:[#allocation5 + $0x48] sm:$0xff]  ;;  %v780_v50 = vld [vmem:[#allocation5 + $0x50] sm:$0xff]  ;;  %s1448_s29 = sshll.u32 %s1978_s25, 4 }
  0x6e   : > { %s337_s17 = scalar_lea.vmem %s2251_s2, %s1452_s19  ;;  %1621 = vmatpush3.bf16.msra.mxu1 %v1618_v9  ;;  %s332_s26 = scalar_lea.vmem %s2249_s0, %s1452_s19  ;;  %v1425_v17 = vsel %vm349_vm0, 1.0, %v1918_v16  ;;  %v1642_v49 = vpack.c.bf16 %v779_v46, %v778_v45  ;;  %v781_v51 = vld [vmem:[#allocation5 + $0x58] sm:$0xff]  ;;  %v947_v58 = vld [vmem:[#allocation5 + $0x60] sm:$0xff]  ;;  %v948_v59 = vld [vmem:[#allocation5 + $0x68] sm:$0xff] }
  0x6f   : > { %v342_v1 = vld [vmem:[%s337_s17] sm:$0xff]  ;;  %v343_v4 = vld [vmem:[%s337_s17 + $0x8] sm:$0xff]  ;;  %1623 = vmatprep.subr.bf16.mxu1 %v1622_v11  ;;  %vm350_vm1 = vcmp.eq.s32.totalorder %v346_v15, %v348_v14  ;;  %v1646_v52 = vpack.c.bf16 %v781_v51, %v780_v50  ;;  %v1654_v62 = vpack.c.bf16 %v948_v59, %v947_v58  ;;  %v949_v63 = vld [vmem:[#allocation5 + $0x70] sm:$0xff]  ;;  %s327_s19 = scalar_lea.vmem [#allocation8], %s2138_s30  ;;  %s2205_s27 = scalar_lea.hbm %s2255_s6, %s1448_s29 }
  0x70   : > { %359 = vperm.xlu0 %1753, %v342_v1   ;;  %v338_v18 = vld [vmem:[%s332_s26] sm:$0xff]  ;;  %v1426_v20 = vsel %vm350_vm1, 1.0, %v1918_v16  ;;  %v339_v21 = vld [vmem:[%s332_s26 + $0x8] sm:$0xff]  ;;  %v950_v0 = vld [vmem:[#allocation5 + $0x78] sm:$0xff]  ;;  %s1300_s20 = sshll.u32 %s327_s19, 4  ;;  %p2269_p2 = scmp.ne.s32.totalorder %s2264_s9, 0  ;;  %s2207_s20 = int_to_ptr.vmem [resolvable:$true] %s1300_s20 }
  0x71   : > { %v355_v19 = vadd.f32 %v1425_v17, %v338_v18  ;;  %v2160_v24 = vadd.f32 %v1426_v20, %v339_v21  ;;  %v1658_v1 = vpack.c.bf16 %v950_v0, %v949_v63  ;;  %v1046_v5 = vld [vmem:[#allocation7 + $0x8] sm:$0xff]  ;;  %v1047_v8 = vld [vmem:[#allocation7 + $0x10] sm:$0xff]  ;;  %v1048_v9 = vld [vmem:[#allocation7 + $0x18] sm:$0xff]  ;;  %s1840_s26 = scalar_lea.vmem %s2207_s20, 16  ;;  %s1921_s25 = smov [#allocation8]  }
  0x72   : > { %1625 = vmatpush3.bf16.msra.mxu1 %v1622_v11  ;;  %v1666_v10 = vpack.c.bf16 %v1048_v9, %v1047_v8  ;;  %v1125_v11 = vld [vmem:[#allocation7 + $0x20] sm:$0xff]  ;;  %v1126_v12 = vld [vmem:[#allocation7 + $0x28] sm:$0xff]  ;;  %p1841_p0 = scmp.ne.s32.totalorder %s2207_s20, %s1840_s26  ;;  %s1844_s13 = sshll.u32 %s1921_s25, 4  ;;  %s1845_s13 = int_to_ptr.vmem [resolvable:$false] %s1844_s13 }
  0x73   : > { %v1669_v13 = vpack.c.bf16 %v1126_v12, %v1125_v11  ;;  %v1206_v32 = vld [vmem:[#allocation7 + $0x40] sm:$0xff]  ;;  %v1207_v33 = vld [vmem:[#allocation7 + $0x48] sm:$0xff]  ;;  %s1846_s10 = scalar_lea.vmem %s1845_s13, 32  ;;  %p1847_p9 = scmp.lt.s32.totalorder %s2207_s20, %s1845_s13 }
  0x74   : > { %364 = vperm.xlu0 %1753, %v343_v4   ;;  %v1045_v4 = vld [vmem:[#allocation7] sm:$0xff]  ;;  %p1842_p3 = pnand %p1841_p0, %p2269_p2  ;;  %p1848_p12 = scmp.lt.s32.totalorder %s1846_s10, %s1840_s26 }
  0x75   : > { %v1663_v6 = vpack.c.bf16 %v1046_v5, %v1045_v4 }
  0x76   : > { %p1843_p7 = pneg %p1842_p3  ;;  %p1849_p1 = por %p1848_p12, %p1847_p9 }
  0x78   : > { %p1850_p13 = pnand %p1849_p1, %p1843_p7 }
  0xef   : > { %v360_v22 = vpop.permute.xlu0 %359 }
  0xf0   : > { %v367_v23 = vmul.f32 %v360_v22, %v355_v19 }
  0xf2   : > { %1513 = vmatprep.mubr.msk.f32.mxu0 %vm369_vm2, %v367_v23 }
  0xf3   : > { %v365_v25 = vpop.permute.xlu0 %364 }
  0xf4   : > { %v368_v26 = vmul.f32 %v365_v25, %v2160_v24 }
  0xf6   : > { %1514 = vmatmul.mubr.msk.f32.vlgmr.msra.gmra.mrb[0].mxu0 %vm369_vm2, %v368_v26 }
  0xf7   : > { %1531 = vmatprep.mubr.msk.f32.mxu0 %vm369_vm2, %v367_v23 }
 0x1c9   : > { %v1515_v27 = vpop.f32.mrb[0].mxu0 }
 0x1ca   : > { %v442_v28 = vpop.f32.mrb[1].mxu0 }
 0x1cb   : > { %1524 = vmatprep.mubr.msk.f32.mxu1 %vm455_vm3, %v442_v28 }
 0x1cc   : > { %1525 = vmatmul.mubr.msk.f32.vlgmr.msra.gmra.mrb[0].mxu1 %vm455_vm3, %v1515_v27 }
 0x1cd   : > { %1549 = vmatprep.mubr.msk.f32.mxu1 %vm369_vm2, %v367_v23 }
 0x29f   : > { %v1526_v29 = vpop.f32.mrb[0].mxu1 }
 0x2a0   : > { %v538_v30 = vmax.f32 %v1526_v29, 0.0  ;;  %v528_v31 = vpop.f32.mrb[1].mxu1  ;;  %v1127_v29 = vld [vmem:[#allocation7 + $0x30] sm:$0xff] }
 0x2a1   : > { %v537_v34 = vmax.f32 %v528_v31, 0.0 }
 0x2a3   : > { %v1626_v35 = vpack.c.bf16 %v538_v30, %v537_v34  ;;  %v1128_v30 = vld [vmem:[#allocation7 + $0x38] sm:$0xff]  ;;  %v1675_v34 = vpack.c.bf16 %v1207_v33, %v1206_v32 }
 0x2a4   : > { %v1672_v31 = vpack.c.bf16 %v1128_v30, %v1127_v29 }
 0x2a5   : > { %1627 = vmatprep.subr.bf16.mxu0 %v1626_v35 }
 0x2a6   : > { %1629 = vmatpush3.bf16.msra.mxu0 %v1626_v35  ;;  %v1049_v35 = vld [vmem:[%s2254_s5] sm:$0x1] }
 0x2a7   : > { %1631 = vmatprep.subr.bf16.mxu0 %v1630_v36 }
 0x2a9   : > { %1532 = vmatmul.mubr.msk.f32.vlgmr.msra.gmra.mrb[2].mxu0 %vm369_vm2, %v368_v26 }
 0x2aa   : > { %1633 = vmatpush3.bf16.msra.mxu0 %v1630_v36 }
 0x2ab   : > { %1635 = vmatprep.subr.bf16.mxu0 %v1634_v39 }
 0x2ae   : > { %1637 = vmatpush3.bf16.msra.mxu0 %v1634_v39 }
 0x37c   : > { %v1533_v40 = vpop.f32.mrb[2].mxu0 }
 0x37d   : > { %v605_v41 = vpop.f32.mrb[3].mxu0 }
 0x37e   : > { %1542 = vmatprep.mubr.msk.f32.mxu0 %vm455_vm3, %v605_v41 }
 0x37f   : > { %1543 = vmatmul.mubr.msk.f32.vlgmr.msra.gmra.mrb[4].mxu0 %vm455_vm3, %v1533_v40  ;;  %v1209_v40 = vld [vmem:[#allocation7 + $0x58] sm:$0xff] }
 0x380   : > { %1567 = vmatprep.mubr.msk.f32.mxu0 %vm369_vm2, %v355_v19 }
 0x452   : > { %v1544_v42 = vpop.f32.mrb[4].mxu0 }
 0x453   : > { %v701_v43 = vmax.f32 %v1544_v42, 0.0  ;;  %v691_v44 = vpop.f32.mrb[5].mxu0  ;;  %v1444_v42 = vld [vmem:[%s2254_s5 + $0x1] sm:$0x1] }
 0x454   : > { %v700_v47 = vmax.f32 %v691_v44, 0.0 }
 0x456   : > { %v1638_v48 = vpack.c.bf16 %v701_v43, %v700_v47  ;;  %v1446_v47 = vld [vmem:[%s2254_s5 + $0x2] sm:$0x1] }
 0x458   : > { %1639 = vmatprep.subr.bf16.mxu1 %v1638_v48 }
 0x459   : > { %1641 = vmatpush3.bf16.msra.mxu1 %v1638_v48 }
 0x45a   : > { %1643 = vmatprep.subr.bf16.mxu1 %v1642_v49 }
 0x45c   : > { %1550 = vmatmul.mubr.msk.f32.vlgmr.msra.gmra.mrb[2].mxu1 %vm369_vm2, %v368_v26 }
 0x45d   : > { %1645 = vmatpush3.bf16.msra.mxu1 %v1642_v49 }
 0x45e   : > { %1647 = vmatprep.subr.bf16.mxu1 %v1646_v52 }
 0x461   : > { %1649 = vmatpush3.bf16.msra.mxu1 %v1646_v52 }
 0x462   : > { %1662 = vmatprep.subr.bf16.mxu1 %v1919_v7 }
 0x52f   : > { %v1551_v53 = vpop.f32.mrb[2].mxu1 }
 0x530   : > { %v768_v54 = vpop.f32.mrb[3].mxu1 }
 0x531   : > { %1560 = vmatprep.mubr.msk.f32.mxu1 %vm455_vm3, %v768_v54 }
 0x532   : > { %1561 = vmatmul.mubr.msk.f32.vlgmr.msra.gmra.mrb[4].mxu1 %vm455_vm3, %v1551_v53 }
 0x533   : > { %1664 = vmatpush3.bf16.msra.mxu1 %v1663_v6  ;;  %1589 = vmatprep.mubr.msk.f32.mxu1 %vm1920_vm4, %v1918_v16 }
 0x534   : > { %1665 = vmatprep.subr.bf16.mxu1 %v1919_v7 }
 0x537   : > { %1667 = vmatpush3.bf16.msra.mxu1 %v1666_v10 }
 0x538   : > { %1674 = vmatprep.subr.bf16.mxu1 %v1919_v7 }
 0x605   : > { %v1562_v55 = vpop.f32.mrb[4].mxu1 }
 0x606   : > { %v864_v56 = vmax.f32 %v1562_v55, 0.0  ;;  %v854_v57 = vpop.f32.mrb[5].mxu1 }
 0x607   : > { %v863_v60 = vmax.f32 %v854_v57, 0.0 }
 0x609   : > { %v1650_v61 = vpack.c.bf16 %v864_v56, %v863_v60 }
 0x60b   : > { %1651 = vmatprep.subr.bf16.mxu0 %v1650_v61 }
 0x60c   : > { %1653 = vmatpush3.bf16.msra.mxu0 %v1650_v61 }
 0x60d   : > { %1655 = vmatprep.subr.bf16.mxu0 %v1654_v62 }
 0x60f   : > { %1568 = vmatmul.mubr.msk.f32.vlgmr.msra.gmra.mrb[6].mxu0 %vm369_vm2, %v2160_v24 }
 0x610   : > { %1657 = vmatpush3.bf16.msra.mxu0 %v1654_v62 }
 0x611   : > { %1659 = vmatprep.subr.bf16.mxu0 %v1658_v1 }
 0x614   : > { %1661 = vmatpush3.bf16.msra.mxu0 %v1658_v1 }
 0x615   : > { %1668 = vmatprep.subr.bf16.mxu0 %v1919_v7 }
 0x6e2   : > { %v1569_v2 = vpop.f32.mrb[6].mxu0 }
 0x6e3   : > { %v937_v3 = vpop.f32.mrb[7].mxu0 }
 0x6e4   : > { %1578 = vmatprep.mubr.msk.f32.mxu0 %vm455_vm3, %v937_v3 }
 0x6e5   : > { %1579 = vmatmul.mubr.msk.f32.vlgmr.msra.gmra.mrb[8].mxu0 %vm455_vm3, %v1569_v2 }
 0x6e6   : > { %1600 = vmatprep.mubr.msk.f32.mxu0 %vm1920_vm4, %v1918_v16  ;;  %1670 = vmatpush3.bf16.msra.mxu0 %v1669_v13 }
 0x6e7   : > { %1671 = vmatprep.subr.bf16.mxu0 %v1919_v7 }
 0x6ea   : > { %1673 = vmatpush3.bf16.msra.mxu0 %v1672_v31 }
 0x7b8   : > { %v1580_v14 = vpop.f32.mrb[8].mxu0 }
 0x7b9   : > { %v1033_v15 = vmax.f32 %v1580_v14, 0.0  ;;  %v1023_v17 = vpop.f32.mrb[9].mxu0 }
 0x7ba   : > { %v1032_v18 = vmax.f32 %v1023_v17, 0.0 }
 0x7bb   : > { %v1035_v19 = vsel %vm455_vm3, %v1033_v15, 0.0 }
 0x7bc   : > { %v1034_v20 = vsel %vm455_vm3, %v1032_v18, 0.0 }
 0x7bd   : > { %v1036_v21 = vadd.f32 %v1035_v19, %v1034_v20 }
 0x7bf   : > { %v1037_v22 = vrot.slane %v1036_v21, 4 }
 0x7c1   : > { %v1038_v23 = vadd.f32 %v1037_v22, %v1036_v21 }
 0x7c3   : > { %v1039_v24 = vrot.slane %v1038_v23, 2 }
 0x7c5   : > { %v1040_v25 = vadd.f32 %v1039_v24, %v1038_v23 }
 0x7c7   : > { %v1041_v26 = vrot.slane %v1040_v25, 1 }
 0x7c9   : > { %v1042_v27 = vadd.f32 %v1041_v26, %v1040_v25 }
 0x7cb   : > { %v1044_v28 = vmul.f32 0.0625, %v1042_v27 }
 0x7cd   : > { %1590 = vmatmul.mubr.msk.f32.vlgmr.msra.gmra.mrb[6].mxu1 %vm455_vm3, %v1044_v28 }
 0x7ce   : > { %1611 = vmatprep.mubr.msk.f32.mxu1 %vm1920_vm4, %v1918_v16  ;;  %1676 = vmatpush3.bf16.msra.mxu1 %v1675_v34  ;;  %v1208_v16 = vld [vmem:[#allocation7 + $0x50] sm:$0xff] }
 0x7cf   : > { %1677 = vmatprep.subr.bf16.mxu1 %v1919_v7  ;;  %v1678_v41 = vpack.c.bf16 %v1209_v40, %v1208_v16 }
 0x7d2   : > { %1679 = vmatpush3.bf16.msra.mxu1 %v1678_v41 }
 0x8a0   : > { %v1119_v36 = vpop.f32.mrb[6].mxu1 }
 0x8a1   : > { %v1120_v37 = vadd.f32 %v1119_v36, %v1049_v35  ;;  %v1591_v38 = vpop.f32.mrb[7].mxu1 }
 0x8a3   : > { %v1123_v39 = vmax.f32 %v1120_v37, 0.0 }
 0x8a5   : > { %1601 = vmatmul.mubr.msk.f32.vlgmr.msra.gmra.mrb[10].mxu0 %vm455_vm3, %v1123_v39 }
 0x978   : > { %v1200_v43 = vpop.f32.mrb[10].mxu0 }
 0x979   : > { %v1201_v44 = vadd.f32 %v1444_v42, %v1200_v43  ;;  %v1602_v45 = vpop.f32.mrb[11].mxu0 }
 0x97b   : > { %v1204_v46 = vmax.f32 %v1201_v44, 0.0 }
 0x97d   : > { %1612 = vmatmul.mubr.msk.f32.vlgmr.msra.gmra.mrb[8].mxu1 %vm455_vm3, %v1204_v46 }
 0xa50   : > { %v1281_v48 = vpop.f32.mrb[8].mxu1 }
 0xa51   : > { %v1282_v49 = vadd.f32 %v1446_v47, %v1281_v48  ;;  %v1613_v50 = vpop.f32.mrb[9].mxu1 }
 0xa53   : > { %1286 = vst.msk [vmem:[%s327_s19] sm:$0x1] %vm1285_vm5, %v1282_v49 }
 0xa54   : > { %1853 = shalt.err (!%p1850_p13)
}
 0xa55   : > { %s1854_s30 = scalar_lea.hbm %s2205_s27, 16  ;;  %s1858_s7 = scalar_lea.hbm %s2255_s6, 32 }
 0xa56   : > { %p1855_p6 = scmp.ne.s32.totalorder %s2205_s27, %s1854_s30  ;;  %p1859_p5 = scmp.lt.u32.totalorder %s2205_s27, %s2255_s6 }
 0xa57   : > { %p1860_p11 = scmp.lt.u32.totalorder %s1858_s7, %s1854_s30  ;;  %p1862_p0 = scmp.lt.u32.totalorder %s1854_s30, %s2205_s27 }
 0xa58   : > { %p1856_p10 = pnand %p1855_p6, %p2269_p2 }
 0xa59   : > { %p1861_p8 = por %p1860_p11, %p1859_p5 }
 0xa5a   : > { %p1857_p4 = pneg %p1856_p10 }
 0xa5b   : > { %p1863_p3 = por %p1862_p0, %p1861_p8 }
 0xa5d   : > { %p1864_p7 = pnand %p1863_p3, %p1857_p4 }
 0xa5f   : > { %1867 = shalt.err (!%p1864_p7)
}
 0xa60   : > { %1690 = dma.vmem_to_hbm [thread:$0]  (%p2269_p2), %s2207_s20, 16, %s2205_s27, %s1288_s18  }
 0xa61 PF: > { %s1312_s19 = sand.u32 1, %s1898_s21   ;;  %p2270_p9 = scmp.ne.s32.totalorder %s2260_s28, 0 }
 0xa62   : > { %p2271_p12 = scmp.ge.s32.totalorder %s1910_s24, 2  ;;  %s1313_s16 = scalar_lea.sflag [#allocation4], %s1312_s19 }
 0xa64   : > { %p1704_p1 = pnand %p2271_p12, %p2270_p9 }
 0xa66   : > { %1893 = dma.done.wait (!%p1704_p1), %s1313_s16, 16  }
 0xa67   : > { %1895 = vsyncadd (!%p1704_p1), %s1313_s16, 4294967280  ;;  %p20_p13 = scmp.ge.s32.totalorder %s2073_s8, 4   ;;  %s2272_s21 = smov %s1902_s22 }
 0xa68   : > { %s2273_s22 = smov %s1906_s23  ;;  %s2274_s23 = smov %s2089_s11 }
 0xa69   : > { %s2275_s24 = smov %s2073_s8  ;;  %22 = sbr.rel (!%p20_p13) target bundleno = 6 (0x6), region = 110 }
 0xa70   :  { %1317 = vsyncpa [#allocation3], 1 }
 0xa71   :  { %1319 = vsyncpa [#allocation3 + $0x1], 1 }
 0xa72   :  { %1320 = vsyncpa [#allocation6], 1 }
 0xa73   :  { %1321 = vsyncpa [#allocation4], 1 }
 0xa74   :  { %1323 = vsyncpa [#allocation4 + $0x1], 1 }

</bundles_post_ra>
